<compile_context>
chip_gen: v6e
topology: v6e:2x2x1
jax: 0.10.0
libtpu: 0.0.40
codegen_flags: <defaults>
</compile_context>

<pallas_src>
import functools

import jax
import jax.numpy as jnp
from jax import lax
from jax.experimental import pallas as pl
from jax.experimental.pallas import tpu as pltpu


def _attn_avg_kernel(x_ref, wqkv_ref, bqkv_ref, wo_ref, head_ref,
                     ao_ref, attnw_ref, logit_ref, *, B, L):
    E = wo_ref.shape[0]

    x = x_ref[...]                                                   # (B*L, E)
    head = head_ref[...]                                             # (3, E)

    # Fused in-projection: one MXU pass over the whole batch (96-wide output lanes).
    qkv = jnp.dot(x, wqkv_ref[...],
                  preferred_element_type=jnp.float32) + bqkv_ref[...]  # (B*L, 3E)
    qkv3 = qkv.reshape(B, L, 3 * E)
    q3 = qkv3[..., :E]          # 1/sqrt(E) already folded into Wq / bq at pack time
    k3 = qkv3[..., E:2 * E]
    v3 = qkv3[..., 2 * E:]

    # Batched scores: contract the shared last dim, batch over B (no k.T transpose).
    s = lax.dot_general(q3, k3, (((2,), (2,)), ((0,), (0,))),
                        preferred_element_type=jnp.float32)          # (B, L, L)
    s = s - jnp.max(s, axis=-1, keepdims=True)
    p = jnp.exp(s)
    p = p * pl.reciprocal(jnp.sum(p, axis=-1, keepdims=True), approx=False)
    attnw_ref[...] = p                                               # (B, L, L)

    # Attention output + output projection, flattened back to (B*L, E).
    ah = lax.dot_general(p, v3, (((2,), (1,)), ((0,), (0,))),
                         preferred_element_type=jnp.float32)         # (B, L, E)
    bo = head[0:1, :]                                                # (1, E)
    ao = jnp.dot(ah.reshape(B * L, E), wo_ref[...],
                 preferred_element_type=jnp.float32) + bo            # (B*L, E)
    ao_ref[...] = ao

    # Mean-pool over L, classifier Linear(E, 1) as a VPU multiply + lane reduce.
    pooled = jnp.mean(ao.reshape(B, L, E), axis=1)                   # (B, E)
    wl = head[1:2, :]                                                # (1, E)
    bl = head[2:3, 0:1]                                              # (1, 1)
    logit_ref[...] = jnp.sum(pooled * wl, axis=-1, keepdims=True) + bl  # (B, 1)


def pack_params(params, E):
    """One-time packing: fuse QKV weights, fold 1/sqrt(E) into Wq/bq, pack small operands."""
    wq, wk, wv, wo, bq, bk, bv, bo, wl, bl = params
    scale = jnp.float32(1.0 / float(E) ** 0.5)
    w_qkv = jnp.concatenate([wq * scale, wk, wv], axis=1)            # (E, 3E)
    b_qkv = jnp.concatenate([bq * scale, bk, bv], axis=1)            # (1, 3E)
    bl_row = jnp.pad(bl, ((0, 0), (0, E - 1)))                       # (1, E), bl at [0,0]
    head = jnp.concatenate([bo, wl.T, bl_row], axis=0)               # (3, E) = [bo; wl; bl]
    return w_qkv, b_qkv, wo, head


def self_attention_average(x, packed_params):
    """x: (B, L, E) f32. Returns (log_reg (B,), attn_weights (B,1,L,L), attn_output (B,L,E))."""
    B, L, E = x.shape
    w_qkv, b_qkv, w_o, head = packed_params
    BL = B * L
    x2 = x.reshape(BL, E)   # flatten batch for the fused projections (free in HBM)

    kernel = functools.partial(_attn_avg_kernel, B=B, L=L)

    ao_flat, attn_w, logit = pl.pallas_call(
        kernel,
        grid=(1,),                                            # single pipeline step
        in_specs=[
            pl.BlockSpec((BL, E), lambda i: (0, 0)),          # x (flattened)
            pl.BlockSpec((E, 3 * E), lambda i: (0, 0)),       # fused W_qkv (scale folded)
            pl.BlockSpec((1, 3 * E), lambda i: (0, 0)),       # fused b_qkv (scale folded)
            pl.BlockSpec((E, E), lambda i: (0, 0)),           # W_o
            pl.BlockSpec((3, E), lambda i: (0, 0)),           # head slab [bo; wl; bl]
        ],
        out_specs=[
            pl.BlockSpec((BL, E), lambda i: (0, 0)),          # attn_output (flattened)
            pl.BlockSpec((B, L, L), lambda i: (0, 0, 0)),     # attn_weights
            pl.BlockSpec((B, 1), lambda i: (0, 0)),           # logits
        ],
        out_shape=[
            jax.ShapeDtypeStruct((BL, E), jnp.float32),
            jax.ShapeDtypeStruct((B, L, L), jnp.float32),
            jax.ShapeDtypeStruct((B, 1), jnp.float32),
        ],
        compiler_params=pltpu.CompilerParams(dimension_semantics=("arbitrary",)),
    )(x2, w_qkv, b_qkv, w_o, head)

    attn_output = ao_flat.reshape(B, L, E)
    attn_weights = attn_w[:, None, :, :]       # (B, 1, L, L): num_heads=1, not averaged
    log_reg = logit[:, 0]                      # .squeeze() in the PyTorch module -> (B,)
    return log_reg, attn_weights, attn_output


def _reference(x, params):
    """Pure-JAX reference of the PyTorch forward (eval mode, no dropout, unpacked params)."""
    wq, wk, wv, wo, bq, bk, bv, bo, wl, bl = params
    B, L, E = x.shape
    q = x @ wq + bq
    k = x @ wk + bk
    v = x @ wv + bv
    s = jnp.einsum("ble,bse->bls", q, k) / jnp.sqrt(jnp.float32(E))
    p = jax.nn.softmax(s, axis=-1)
    ah = jnp.einsum("bls,bse->ble", p, v)
    ao = ah @ wo + bo
    pooled = ao.mean(axis=1)
    logit = pooled @ wl + bl
    return logit[:, 0], p[:, None, :, :], ao


def make_params(key, E):
    """Deterministic synthetic parameters (nn.MultiheadAttention + Linear(E,1)).
    Weights are stored pre-transposed: y = x @ W_t + b."""
    ks = jax.random.split(key, 10)
    std = 0.05
    wq = jax.random.normal(ks[0], (E, E), jnp.float32) * std
    wk = jax.random.normal(ks[1], (E, E), jnp.float32) * std
    wv = jax.random.normal(ks[2], (E, E), jnp.float32) * std
    wo = jax.random.normal(ks[3], (E, E), jnp.float32) * std
    bq = jax.random.normal(ks[4], (1, E), jnp.float32) * std
    bk = jax.random.normal(ks[5], (1, E), jnp.float32) * std
    bv = jax.random.normal(ks[6], (1, E), jnp.float32) * std
    bo = jax.random.normal(ks[7], (1, E), jnp.float32) * std
    wl = jax.random.normal(ks[8], (E, 1), jnp.float32) * std
    bl = jax.random.normal(ks[9], (1, 1), jnp.float32) * std
    return (wq, wk, wv, wo, bq, bk, bv, bo, wl, bl)


if __name__ == "__main__":
    B, L, E = 2, 8, 32   # embed_dim == weight_dim (required for the module to type-check)
    key = jax.random.PRNGKey(0)
    kx, kp = jax.random.split(key)
    x = jax.random.normal(kx, (B, L, E), jnp.float32)
    params = make_params(kp, E)
    packed = pack_params(params, E)   # one-time parameter packing / scale folding

    log_reg, attn_w, attn_out = self_attention_average(x, packed)
    jax.block_until_ready((log_reg, attn_w, attn_out))

    # sanity check against a pure-JAX reference (uses the raw, unpacked params)
    ref_lr, ref_w, ref_out = _reference(x, params)
    assert jnp.allclose(log_reg, ref_lr, atol=1e-5), "log_reg mismatch"
    assert jnp.allclose(attn_w, ref_w, atol=1e-5), "attn_weights mismatch"
    assert jnp.allclose(attn_out, ref_out, atol=1e-5), "attn_output mismatch"

    # TODO(synk): attention dropout / classifier nn.Dropout are p=0.0 (identity) here;
    # training-mode stochastic dropout is not implemented.
    print("KERNEL_OK")
</pallas_src>

<mosaic_0001>
module attributes {stable_mosaic.version = 11 : i64} {
  func.func @_attn_avg_kernel(%arg0: i32, %arg1: memref<16x32xf32, #tpu.memory_space<vmem>>, %arg2: memref<32x96xf32, #tpu.memory_space<vmem>>, %arg3: memref<1x96xf32, #tpu.memory_space<vmem>>, %arg4: memref<32x32xf32, #tpu.memory_space<vmem>>, %arg5: memref<3x32xf32, #tpu.memory_space<vmem>>, %arg6: memref<16x32xf32, #tpu.memory_space<vmem>>, %arg7: memref<2x8x8xf32, #tpu.memory_space<vmem>>, %arg8: memref<2x1xf32, #tpu.memory_space<vmem>>) attributes {dimension_semantics = [#tpu.dimension_semantics<arbitrary>], iteration_bounds = array<i64: 1>, scalar_prefetch = 0 : i64, scratch_operands = 0 : i64, tpu.core_type = #tpu.core_type<tc>, window_params = [{pipeline_mode = #tpu.pipeline_mode<synchronous>, transform_indices = @transform_0, window_bounds = array<i64: 16, 32>}, {pipeline_mode = #tpu.pipeline_mode<synchronous>, transform_indices = @transform_1, window_bounds = array<i64: 32, 96>}, {pipeline_mode = #tpu.pipeline_mode<synchronous>, transform_indices = @transform_2, window_bounds = array<i64: 1, 96>}, {pipeline_mode = #tpu.pipeline_mode<synchronous>, transform_indices = @transform_3, window_bounds = array<i64: 32, 32>}, {pipeline_mode = #tpu.pipeline_mode<synchronous>, transform_indices = @transform_4, window_bounds = array<i64: 3, 32>}, {pipeline_mode = #tpu.pipeline_mode<synchronous>, transform_indices = @transform_5, window_bounds = array<i64: 16, 32>}, {pipeline_mode = #tpu.pipeline_mode<synchronous>, transform_indices = @transform_6, window_bounds = array<i64: 2, 8, 8>}, {pipeline_mode = #tpu.pipeline_mode<synchronous>, transform_indices = @transform_7, window_bounds = array<i64: 2, 1>}]} {
    %c0 = arith.constant 0 : index
    %c0_0 = arith.constant 0 : index
    %0 = vector.load %arg1[%c0, %c0_0] : memref<16x32xf32, #tpu.memory_space<vmem>>, vector<16x32xf32>
    %c0_1 = arith.constant 0 : index
    %c0_2 = arith.constant 0 : index
    %1 = vector.load %arg5[%c0_1, %c0_2] : memref<3x32xf32, #tpu.memory_space<vmem>>, vector<3x32xf32>
    %c0_3 = arith.constant 0 : index
    %c0_4 = arith.constant 0 : index
    %2 = vector.load %arg2[%c0_3, %c0_4] : memref<32x96xf32, #tpu.memory_space<vmem>>, vector<32x96xf32>
    %cst = arith.constant dense<0.000000e+00> : vector<16x96xf32>
    %3 = tpu.matmul %0, %2, %cst {dimension_numbers = #tpu.dot_dimension_numbers<[1], [0], [0], [1], [0, 0, 1, 1], [], []>} : vector<16x32xf32>, vector<32x96xf32>, vector<16x96xf32> -> vector<16x96xf32>
    %c0_5 = arith.constant 0 : index
    %c0_6 = arith.constant 0 : index
    %4 = vector.load %arg3[%c0_5, %c0_6] : memref<1x96xf32, #tpu.memory_space<vmem>>, vector<1x96xf32>
    %5 = vector.broadcast %4 : vector<1x96xf32> to vector<16x96xf32>
    %6 = arith.addf %3, %5 : vector<16x96xf32>
    %7 = vector.shape_cast %6 : vector<16x96xf32> to vector<2x8x96xf32>
    %8 = vector.extract_strided_slice %7 {offsets = [0, 0, 0], sizes = [2, 8, 32], strides = [1, 1, 1]} : vector<2x8x96xf32> to vector<2x8x32xf32>
    %9 = vector.extract_strided_slice %7 {offsets = [0, 0, 32], sizes = [2, 8, 32], strides = [1, 1, 1]} : vector<2x8x96xf32> to vector<2x8x32xf32>
    %10 = vector.extract_strided_slice %7 {offsets = [0, 0, 64], sizes = [2, 8, 32], strides = [1, 1, 1]} : vector<2x8x96xf32> to vector<2x8x32xf32>
    %cst_7 = arith.constant dense<0.000000e+00> : vector<2x8x8xf32>
    %11 = tpu.matmul %8, %9, %cst_7 {dimension_numbers = #tpu.dot_dimension_numbers<[2], [2], [1], [1], [0, 0, 0, 1, 1, 1], [0], [0]>} : vector<2x8x32xf32>, vector<2x8x32xf32>, vector<2x8x8xf32> -> vector<2x8x8xf32>
    %cst_8 = arith.constant dense<0xFF800000> : vector<2x8xf32>
    %12 = vector.multi_reduction <maximumf>, %11, %cst_8 [2] : vector<2x8x8xf32> to vector<2x8xf32>
    %13 = vector.shape_cast %12 : vector<2x8xf32> to vector<2x8x1xf32>
    %14 = vector.broadcast %13 : vector<2x8x1xf32> to vector<2x8x8xf32>
    %15 = arith.subf %11, %14 : vector<2x8x8xf32>
    %16 = math.exp %15 : vector<2x8x8xf32>
    %cst_9 = arith.constant dense<0.000000e+00> : vector<2x8xf32>
    %17 = vector.multi_reduction <add>, %16, %cst_9 [2] : vector<2x8x8xf32> to vector<2x8xf32>
    %18 = vector.shape_cast %17 : vector<2x8xf32> to vector<2x8x1xf32>
    %19 = tpu.reciprocal %18 : vector<2x8x1xf32> -> vector<2x8x1xf32>
    %20 = vector.broadcast %19 : vector<2x8x1xf32> to vector<2x8x8xf32>
    %21 = arith.mulf %16, %20 : vector<2x8x8xf32>
    %c0_10 = arith.constant 0 : index
    %c0_11 = arith.constant 0 : index
    %c0_12 = arith.constant 0 : index
    %22 = vector.load %arg7[%c0_10, %c0_11, %c0_12] : memref<2x8x8xf32, #tpu.memory_space<vmem>>, vector<2x8x8xf32>
    tpu.vector_store %arg7[%c0_10, %c0_11, %c0_12], %21 {strides = array<i32>} : memref<2x8x8xf32, #tpu.memory_space<vmem>>, vector<2x8x8xf32>,
    %cst_13 = arith.constant dense<0.000000e+00> : vector<2x8x32xf32>
    %23 = tpu.matmul %21, %10, %cst_13 {dimension_numbers = #tpu.dot_dimension_numbers<[2], [1], [1], [2], [0, 0, 0, 1, 1, 2], [0], [0]>} : vector<2x8x8xf32>, vector<2x8x32xf32>, vector<2x8x32xf32> -> vector<2x8x32xf32>
    %24 = vector.extract_strided_slice %1 {offsets = [0, 0], sizes = [1, 32], strides = [1, 1]} : vector<3x32xf32> to vector<1x32xf32>
    %25 = vector.shape_cast %23 : vector<2x8x32xf32> to vector<16x32xf32>
    %c0_14 = arith.constant 0 : index
    %c0_15 = arith.constant 0 : index
    %26 = vector.load %arg4[%c0_14, %c0_15] : memref<32x32xf32, #tpu.memory_space<vmem>>, vector<32x32xf32>
    %cst_16 = arith.constant dense<0.000000e+00> : vector<16x32xf32>
    %27 = tpu.matmul %25, %26, %cst_16 {dimension_numbers = #tpu.dot_dimension_numbers<[1], [0], [0], [1], [0, 0, 1, 1], [], []>} : vector<16x32xf32>, vector<32x32xf32>, vector<16x32xf32> -> vector<16x32xf32>
    %28 = vector.broadcast %24 : vector<1x32xf32> to vector<16x32xf32>
    %29 = arith.addf %27, %28 : vector<16x32xf32>
    %c0_17 = arith.constant 0 : index
    %c0_18 = arith.constant 0 : index
    %30 = vector.load %arg6[%c0_17, %c0_18] : memref<16x32xf32, #tpu.memory_space<vmem>>, vector<16x32xf32>
    tpu.vector_store %arg6[%c0_17, %c0_18], %29 {strides = array<i32>} : memref<16x32xf32, #tpu.memory_space<vmem>>, vector<16x32xf32>,
    %31 = vector.shape_cast %29 : vector<16x32xf32> to vector<2x8x32xf32>
    %cst_19 = arith.constant dense<0.000000e+00> : vector<2x32xf32>
    %32 = vector.multi_reduction <add>, %31, %cst_19 [1] : vector<2x8x32xf32> to vector<2x32xf32>
    %cst_20 = arith.constant 8.000000e+00 : f32
    %33 = vector.broadcast %cst_20 : f32 to vector<2x32xf32>
    %34 = arith.divf %32, %33 : vector<2x32xf32>
    %35 = vector.extract_strided_slice %1 {offsets = [1, 0], sizes = [1, 32], strides = [1, 1]} : vector<3x32xf32> to vector<1x32xf32>
    %36 = vector.extract_strided_slice %1 {offsets = [2, 0], sizes = [1, 1], strides = [1, 1]} : vector<3x32xf32> to vector<1x1xf32>
    %37 = vector.broadcast %35 : vector<1x32xf32> to vector<2x32xf32>
    %38 = arith.mulf %34, %37 : vector<2x32xf32>
    %cst_21 = arith.constant dense<0.000000e+00> : vector<2xf32>
    %39 = vector.multi_reduction <add>, %38, %cst_21 [1] : vector<2x32xf32> to vector<2xf32>
    %40 = vector.shape_cast %39 : vector<2xf32> to vector<2x1xf32>
    %41 = vector.broadcast %36 : vector<1x1xf32> to vector<2x1xf32>
    %42 = arith.addf %40, %41 : vector<2x1xf32>
    %c0_22 = arith.constant 0 : index
    %c0_23 = arith.constant 0 : index
    %43 = vector.load %arg8[%c0_22, %c0_23] : memref<2x1xf32, #tpu.memory_space<vmem>>, vector<2x1xf32>
    tpu.vector_store %arg8[%c0_22, %c0_23], %42 {strides = array<i32>} : memref<2x1xf32, #tpu.memory_space<vmem>>, vector<2x1xf32>,
    return
  }
  func.func @transform_0(%arg0: i32) -> (i32, i32) {
    %c0_i32 = arith.constant 0 : i32
    %c0_i32_0 = arith.constant 0 : i32
    %c0_i32_1 = arith.constant 0 : i32
    return %c0_i32, %c0_i32_0 : i32, i32
  }
  func.func @transform_1(%arg0: i32) -> (i32, i32) {
    %c0_i32 = arith.constant 0 : i32
    %c0_i32_0 = arith.constant 0 : i32
    %c0_i32_1 = arith.constant 0 : i32
    return %c0_i32, %c0_i32_0 : i32, i32
  }
  func.func @transform_2(%arg0: i32) -> (i32, i32) {
    %c0_i32 = arith.constant 0 : i32
    %c0_i32_0 = arith.constant 0 : i32
    %c0_i32_1 = arith.constant 0 : i32
    return %c0_i32, %c0_i32_0 : i32, i32
  }
  func.func @transform_3(%arg0: i32) -> (i32, i32) {
    %c0_i32 = arith.constant 0 : i32
    %c0_i32_0 = arith.constant 0 : i32
    %c0_i32_1 = arith.constant 0 : i32
    return %c0_i32, %c0_i32_0 : i32, i32
  }
  func.func @transform_4(%arg0: i32) -> (i32, i32) {
    %c0_i32 = arith.constant 0 : i32
    %c0_i32_0 = arith.constant 0 : i32
    %c0_i32_1 = arith.constant 0 : i32
    return %c0_i32, %c0_i32_0 : i32, i32
  }
  func.func @transform_5(%arg0: i32) -> (i32, i32) {
    %c0_i32 = arith.constant 0 : i32
    %c0_i32_0 = arith.constant 0 : i32
    %c0_i32_1 = arith.constant 0 : i32
    return %c0_i32, %c0_i32_0 : i32, i32
  }
  func.func @transform_6(%arg0: i32) -> (i32, i32, i32) {
    %c0_i32 = arith.constant 0 : i32
    %c0_i32_0 = arith.constant 0 : i32
    %c0_i32_1 = arith.constant 0 : i32
    %c0_i32_2 = arith.constant 0 : i32
    return %c0_i32, %c0_i32_0, %c0_i32_1 : i32, i32, i32
  }
  func.func @transform_7(%arg0: i32) -> (i32, i32) {
    %c0_i32 = arith.constant 0 : i32
    %c0_i32_0 = arith.constant 0 : i32
    %c0_i32_1 = arith.constant 0 : i32
    return %c0_i32, %c0_i32_0 : i32, i32
  }
}

</mosaic_0001>

<bundles_post_ra>
// kernel: tpu_custom_call.1
= control target key start
LH: loop header
LB: loop body
LE: loop exit
PB: predicated region body
PF: predicated region fallthrough
CT: control target
= control target key end

     0   :  { %13 = vsyncpa [#allocation3], 0  ;;  %s984_s0 = inlined_call_operand.hbm [shape: f32[16,32], index: 0, kind: input, shape index: {}]   ;;  %s985_s1 = inlined_call_operand.hbm [shape: f32[32,96], index: 1, kind: input, shape index: {}]   ;;  %s986_s2 = inlined_call_operand.vmem [shape: f32[1,96], index: 2, kind: input, shape index: {}]   ;;  %s987_s3 = inlined_call_operand.hbm [shape: f32[32,32], index: 3, kind: input, shape index: {}]   ;;  %s988_s4 = inlined_call_operand.vmem [shape: f32[3,32], index: 4, kind: input, shape index: {}]   ;;  %s989_s5 = inlined_call_operand.hbm [shape: f32[16,32], index: 5, kind: output, shape index: {0}]   ;;  %s990_s6 = inlined_call_operand.hbm [shape: f32[2,8,8], index: 6, kind: output, shape index: {1}]   ;;  %s991_s7 = inlined_call_operand.vmem [shape: f32[2,1], index: 7, kind: output, shape index: {2}]  }
   0x1   :  { %14 = vsyncpa [#allocation6], 0 }
   0x2   :  { %15 = vsyncpa [#allocation4], 0 }
   0x3   :  { %16 = vsyncpa [#allocation10], 0  ;;  %s862_s24 = smov [#allocation5]   ;;  %s863_s26 = smov [#allocation2]  }
   0x4   :  { %s34_s25 = sshll.u32 %s862_s24, 4  ;;  %s22_s27 = sshll.u32 %s863_s26, 4  ;;  %s35_s25 = int_to_ptr.vmem [resolvable:$true] %s34_s25  ;;  %s23_s27 = int_to_ptr.vmem [resolvable:$true] %s22_s27 }
   0x5   :  { %s762_s28 = scalar_lea.vmem %s35_s25, 512  ;;  %p767_p1 = scmp.lt.s32.totalorder %s35_s25, %s35_s25 }
   0x6   :  { %p763_p0 = scmp.ne.s32.totalorder %s35_s25, %s762_s28  ;;  %p768_p2 = scmp.lt.s32.totalorder %s762_s28, %s762_s28 }
   0x8   :  { %p769_p3 = por %p768_p2, %p767_p1 }
   0xa   :  { %p770_p4 = pnand %p769_p3, %p763_p0 }
   0xc   :  { %773 = shalt.err (!%p770_p4)
}
   0xd   :  { %s864_s29 = smov 128   ;;  %s865_s30 = smov 8  }
   0xe   :  { %40 = dma.hbm_to_vmem [thread:$0]  %s985_s1, 512, %s35_s25, [#allocation6], %s864_s29, %s864_s29, %s865_s30  }
   0xf   :  { %s782_s10 = scalar_lea.vmem %s23_s27, 256  ;;  %p787_p6 = scmp.lt.s32.totalorder %s23_s27, %s23_s27 }
  0x10   :  { %p783_p5 = scmp.ne.s32.totalorder %s23_s27, %s782_s10  ;;  %p788_p7 = scmp.lt.s32.totalorder %s782_s10, %s782_s10 }
  0x12   :  { %p789_p8 = por %p788_p7, %p787_p6 }
  0x14   :  { %p790_p9 = pnand %p789_p8, %p783_p5 }
  0x16   :  { %793 = shalt.err (!%p790_p9)
}
  0x17   :  { %28 = dma.hbm_to_vmem [thread:$0]  %s984_s0, 256, %s23_s27, [#allocation3], %s864_s29, %s864_s29, %s865_s30  }
  0x18   :  { %s866_s13 = smov [#allocation7]  }
  0x19   :  { %s48_s14 = sshll.u32 %s866_s13, 4  ;;  %s49_s14 = int_to_ptr.vmem [resolvable:$true] %s48_s14 }
  0x1a   :  { %s802_s15 = scalar_lea.vmem %s49_s14, 512  ;;  %p807_p11 = scmp.lt.s32.totalorder %s49_s14, %s49_s14 }
  0x1b   :  { %p803_p10 = scmp.ne.s32.totalorder %s49_s14, %s802_s15  ;;  %p808_p12 = scmp.lt.s32.totalorder %s802_s15, %s802_s15 }
  0x1d   :  { %p809_p13 = por %p808_p12, %p807_p11 }
  0x1f   :  { %p810_p0 = pnand %p809_p13, %p803_p10 }
  0x21   :  { %813 = shalt.err (!%p810_p0)
}
  0x22   :  { %54 = dma.hbm_to_vmem [thread:$0]  %s987_s3, 512, %s49_s14, [#allocation6], %s864_s29, %s864_s29, %s865_s30  }
  0x23   :  { %854 = dma.done.wait [#allocation3], 256  }
  0x24   :  { %855 = vsyncadd [#allocation3], 4294967040 }
  0x25   :  { %856 = dma.done.wait [#allocation6], 1024  }
  0x26   :  { %857 = vsyncadd [#allocation6], 4294966272  ;;  %vm80_vm0 = vcmask 261120   ;;  %v72_v0 = vld [vmem:[#allocation5 + $0x18] sm:$0xff]  ;;  %v71_v1 = vld [vmem:[#allocation5 + $0x10] sm:$0xff]  ;;  %v867_v6 = vmov 0.0   ;;  %v497_v46 = vlaneseq }
  0x27   :  { %693 = vmatprep.subr.mxu0 %v72_v0  ;;  %v66_v2 = vld [vmem:[#allocation2] sm:$0xff]  ;;  %v70_v3 = vld [vmem:[#allocation5 + $0x8] sm:$0xff]  ;;  %v69_v4 = vld [vmem:[#allocation5] sm:$0xff]  ;;  %704 = vmatprep.subr.mxu1 %v867_v6  ;;  %vm868_vm1 = vmmov 0   ;;  %s869_s17 = smov 96   ;;  %vm316_vm2 = vcmask 64512  }
  0x28   :  { %694 = vmatpush3.msra.mxu0 %v72_v0  ;;  %701 = vmatprep.mubr.msk.f32.mxu0 %vm80_vm0, %v66_v2  ;;  %v67_v5 = vld [vmem:[#allocation2 + $0x8] sm:$0xff]  ;;  %v662_v8 = vld [vmem:[%s986_s2] ss:$0 sm:$0xff]  ;;  %s870_s2 = smov 64   ;;  %v494_v40 = vld [vmem:[#allocation7 + $0x8] sm:$0xff]  ;;  %v498_v47 = vshrl.u32 %v497_v46, 7 }
  0x29   :  { %695 = vmatprep.subr.mxu0 %v71_v1  ;;  %706 = vmatprep.mubr.msk.f32.mxu1 %vm868_vm1, %v867_v6  ;;  %v496_v31 = vld [vmem:[#allocation7 + $0x18] sm:$0xff]  ;;  %v495_v32 = vld [vmem:[#allocation7 + $0x10] sm:$0xff]  ;;  %v493_v41 = vld [vmem:[#allocation7] sm:$0xff]  ;;  %vm610_vm3 = vcmask 1041409   ;;  %vm613_vm4 = vcmask 254976   ;;  %s872_s21 = smov [#allocation9]  }
  0x2a   :  { %696 = vmatpush3.msra.mxu0 %v71_v1  ;;  %v499_v48 = vsub.s32 0, %v498_v47  ;;  %v68_v49 = vld [vmem:[%s988_s4] sm:$0x7]  ;;  %v603_v63 = vsub.s32 1, %v498_v47  ;;  %s871_s4 = smov [#allocation8]   ;;  %s641_s22 = sshll.u32 %s872_s21, 4  ;;  %s642_s22 = int_to_ptr.vmem [resolvable:$true] %s641_s22 }
  0x2b   :  { %697 = vmatprep.subr.mxu0 %v70_v3  ;;  %s629_s20 = sshll.u32 %s871_s4, 4  ;;  %s630_s20 = int_to_ptr.vmem [resolvable:$true] %s629_s20 }
  0x2c   :  { %698 = vmatpush3.msra.mxu0 %v70_v3  ;;  %v500_v50 = vrot.slane %v68_v49, %v499_v48  ;;  %s814_s23 = scalar_lea.vmem %s630_s20, 256  ;;  %p819_p2 = scmp.lt.s32.totalorder %s630_s20, %s630_s20 }
  0x2d   :  { %699 = vmatprep.subr.mxu0 %v69_v4  ;;  %p815_p1 = scmp.ne.s32.totalorder %s630_s20, %s814_s23  ;;  %p820_p3 = scmp.lt.s32.totalorder %s814_s23, %s814_s23 }
  0x2e   :  { %700 = vmatpush3.msra.mxu0 %v69_v4  ;;  %v604_v4 = vrot.slane %v68_v49, %v603_v63 }
  0x2f   :  { %702 = vmatmul.mubr.msk.f32.vlgmr.msra.gmra.mxu0 %vm80_vm0, %v67_v5  ;;  %724 = vmatprep.subr.mxu0 %v496_v31  ;;  %p821_p4 = por %p820_p3, %p819_p2 }
  0x30   :  { %725 = vmatpush3.msra.mxu0 %v496_v31 }
  0x31   :  { %726 = vmatprep.subr.mxu0 %v495_v32  ;;  %p822_p5 = pnand %p821_p4, %p815_p1 }
  0x32   :  { %727 = vmatpush3.msra.mxu0 %v495_v32 }
  0x33   :  { %728 = vmatprep.subr.mxu0 %v494_v40 }
  0x34   :  { %729 = vmatpush3.msra.mxu0 %v494_v40 }
  0x35   :  { %730 = vmatprep.subr.mxu0 %v493_v41 }
  0x36   :  { %731 = vmatpush3.msra.mxu0 %v493_v41 }
  0xef   :  { %v703_v7 = vpop.f32.mrf.mxu0 }
  0xf0   :  { %v159_v11 = vadd.f32 %v703_v7, %v662_v8 }
  0xf1   :  { %v153_v9 = vpop.f32.mrf.mxu0 }
  0xf2   :  { %v154_v10 = vadd.f32 %v662_v8, %v153_v9 }
  0xf4   :  { %163 = vrot.lane.b32.xlu0 %v154_v10, %s869_s17 }
  0xf8   :  { %240 = vrot.lane.b32.xlu0 %v159_v11, %s869_s17 }
 0x166   :  { %v164_v12 = vpop.permute.xlu0 %163 }
 0x167   :  { %705 = vmatpush3.xpose.msk.msra.mxu1 %vm80_vm0, %v164_v12 }
 0x168   :  { %709 = vmatprep.subr.mxu1 %v867_v6 }
 0x16a   :  { %707 = vmatmul.mubr.msk.f32.vlgmr.msra.gmra.mxu1 %vm80_vm0, %v154_v10  ;;  %v241_v13 = vpop.permute.xlu0 %240 }
 0x16b   :  { %710 = vmatpush3.xpose.msk.msra.mxu1 %vm80_vm0, %v241_v13  ;;  %711 = vmatprep.mubr.msk.f32.mxu1 %vm868_vm1, %v867_v6 }
 0x16c   :  { %714 = vmatprep.subr.mxu1 %v867_v6 }
 0x16e   :  { %712 = vmatmul.mubr.msk.f32.vlgmr.msra.gmra.mxu1 %vm80_vm0, %v159_v11 }
 0x16f   :  { %716 = vmatprep.mubr.msk.f32.mxu1 %vm868_vm1, %v867_v6 }
 0x22a   :  { %v235_v14 = vpop.f32.mrf.mxu1 }
 0x22b   :  { %v317_v15 = vsel %vm316_vm2, %v235_v14, -inf }
 0x22c   :  { %318 = vmax.xlane.f32.xlu1 %v317_v15  ;;  %v708_v16 = vpop.f32.mrf.mxu1 }
 0x22e   :  { %v312_v17 = vpop.f32.mrf.mxu1 }
 0x22f   :  { %v320_v18 = vsel %vm316_vm2, %v312_v17, -inf }
 0x230   :  { %321 = vmax.xlane.f32.xlu1 %v320_v18  ;;  %v713_v19 = vpop.f32.mrf.mxu1 }
 0x241   :  { %341 = vrot.lane.b32.xlu1 %v154_v10, %s870_s2 }
 0x2b5   :  { %v319_v20 = vpop.xlane.xlu1 %318 }
 0x2b6   :  { %v323_v21 = vsub.f32 %v235_v14, %v319_v20 }
 0x2b8   :  { %v325_v22 = vmul.f32 1.442695, %v323_v21 }
 0x2b9   :  { %v322_v23 = vpop.xlane.xlu1 %321 }
 0x2ba   :  { %746 = vpow2.f32 %v325_v22  ;;  %v324_v24 = vsub.f32 %v312_v17, %v322_v23 }
 0x2bc   :  { %v327_v25 = vmul.f32 1.442695, %v324_v24 }
 0x2bd   :  { %v342_v26 = vpop.permute.xlu1 %341 }
 0x2be   :  { %748 = vpow2.f32 %v327_v25  ;;  %715 = vmatpush3.msra.mxu1 %v342_v26 }
 0x2bf   :  { %719 = vmatprep.subr.mxu1 %v867_v6 }
 0x2c7   :  { %v747_v27 = vpop.eup %746 }
 0x2c8   :  { %v329_v28 = vsel %vm316_vm2, %v747_v27, 0.0 }
 0x2c9   :  { %330 = vadd.xlane.f32.xlu0 %v329_v28 }
 0x2cb   :  { %v749_v29 = vpop.eup %748 }
 0x2cc   :  { %v332_v30 = vsel %vm316_vm2, %v749_v29, 0.0 }
 0x2cd   :  { %333 = vadd.xlane.f32.xlu1 %v332_v30 }
 0x2de   :  { %417 = vrot.lane.b32.xlu1 %v159_v11, %s870_s2 }
 0x352   :  { %v331_v33 = vpop.xlane.xlu0 %330 }
 0x353   :  { %750 = vrcp.f32 %v331_v33 }
 0x356   :  { %v334_v34 = vpop.xlane.xlu1 %333 }
 0x357   :  { %752 = vrcp.f32 %v334_v34 }
 0x35a   :  { %v418_v37 = vpop.permute.xlu1 %417 }
 0x360   :  { %v751_v35 = vpop.eup %750 }
 0x361   :  { %v337_v36 = vmul.f32 %v751_v35, %v747_v27 }
 0x363   :  { %717 = vmatmul.mubr.msk.f32.vlgmr.msra.gmra.mxu1 %vm316_vm2, %v337_v36  ;;  %339 = vst.msk [vmem:[#allocation9] sm:$0xff] %vm316_vm2, %v337_v36 }
 0x364   :  { %v753_v38 = vpop.eup %752  ;;  %720 = vmatpush3.msra.mxu1 %v418_v37  ;;  %721 = vmatprep.mubr.msk.f32.mxu1 %vm868_vm1, %v867_v6 }
 0x365   :  { %v338_v39 = vmul.f32 %v753_v38, %v749_v29 }
 0x367   :  { %722 = vmatmul.mubr.msk.f32.vlgmr.msra.gmra.mxu1 %vm316_vm2, %v338_v39  ;;  %340 = vst.msk [vmem:[#allocation9 + $0x8] sm:$0xff] %vm316_vm2, %v338_v39 }
 0x423   :  { %v413_v42 = vpop.f32.mrf.mxu1 }
 0x424   :  { %732 = vmatprep.mubr.msk.f32.mxu0 %vm80_vm0, %v413_v42 }
 0x425   :  { %v718_v43 = vpop.f32.mrf.mxu1 }
 0x427   :  { %v489_v44 = vpop.f32.mrf.mxu1 }
 0x428   :  { %733 = vmatmul.mubr.msk.f32.vlgmr.msra.gmra.mxu0 %vm80_vm0, %v489_v44 }
 0x429   :  { %v723_v45 = vpop.f32.mrf.mxu1 }
 0x4e8   :  { %v734_v51 = vpop.f32.mrf.mxu0 }
 0x4e9   :  { %v579_v52 = vadd.f32 %v734_v51, %v500_v50 }
 0x4ea   :  { %v573_v53 = vpop.f32.mrf.mxu0 }
 0x4eb   :  { %v591_v54 = vsel %vm80_vm0, %v579_v52, 0.0  ;;  %583 = vst.msk [vmem:[#allocation8 + $0x8] sm:$0xff] %vm80_vm0, %v579_v52  ;;  %v574_v55 = vadd.f32 %v573_v53, %v500_v50 }
 0x4ec   :  { %v592_v56 = vrot.slane %v591_v54, 4 }
 0x4ed   :  { %v584_v57 = vsel %vm80_vm0, %v574_v55, 0.0  ;;  %582 = vst.msk [vmem:[#allocation8] sm:$0xff] %vm80_vm0, %v574_v55 }
 0x4ee   :  { %v593_v58 = vadd.f32 %v592_v56, %v591_v54  ;;  %v585_v59 = vrot.slane %v584_v57, 4 }
 0x4f0   :  { %v594_v60 = vrot.slane %v593_v58, 2  ;;  %v586_v61 = vadd.f32 %v585_v59, %v584_v57 }
 0x4f2   :  { %v595_v62 = vadd.f32 %v594_v60, %v593_v58  ;;  %v587_v0 = vrot.slane %v586_v61, 2 }
 0x4f4   :  { %v596_v1 = vrot.slane %v595_v62, 1  ;;  %v588_v2 = vadd.f32 %v587_v0, %v586_v61 }
 0x4f6   :  { %v597_v3 = vadd.f32 %v596_v1, %v595_v62  ;;  %v589_v5 = vrot.slane %v588_v2, 1 }
 0x4f8   :  { %v600_v6 = vmul.f32 0.125, %v597_v3  ;;  %v590_v7 = vadd.f32 %v589_v5, %v588_v2 }
 0x4fa   :  { %v599_v8 = vmul.f32 0.125, %v590_v7  ;;  %v606_v9 = vmul.f32 %v604_v4, %v600_v6 }
 0x4fc   :  { %v605_v10 = vmul.f32 %v604_v4, %v599_v8  ;;  %v609_v11 = vrot.slane %v606_v9, 7 }
 0x4fe   :  { %v611_v12 = vsel %vm610_vm3, %v609_v11, %v605_v10 }
 0x4ff   :  { %v614_v13 = vsel %vm613_vm4, %v611_v12, 0.0 }
 0x500   :  { %615 = vadd.xlane.f32.xlu1 %v614_v13 }
 0x501   :  { %825 = shalt.err (!%p822_p5)
}
 0x502   :  { %635 = dma.vmem_to_hbm [thread:$0]  %s630_s20, 256, %s989_s5, [#allocation4], %s864_s29, %s864_s29, %s865_s30  }
 0x503   :  { %s834_s26 = scalar_lea.vmem %s642_s22, 256  ;;  %p839_p7 = scmp.lt.s32.totalorder %s642_s22, %s642_s22 }
 0x504   :  { %p835_p6 = scmp.ne.s32.totalorder %s642_s22, %s834_s26  ;;  %p840_p8 = scmp.lt.s32.totalorder %s834_s26, %s834_s26 }
 0x506   :  { %p841_p9 = por %p840_p8, %p839_p7 }
 0x508   :  { %p842_p10 = pnand %p841_p9, %p835_p6 }
 0x50a   :  { %845 = shalt.err (!%p842_p10)
}
 0x50b   :  { %647 = dma.vmem_to_hbm [thread:$0]  %s642_s22, 256, %s990_s6, [#allocation10], %s864_s29, %s864_s29, %s865_s30   ;;  %v619_v14 = vsub.s32 2, %v498_v47  ;;  %vm622_vm5 = vcmask 1024  }
 0x50d   :  { %v620_v15 = vrot.slane %v68_v49, %v619_v14 }
 0x589   :  { %v616_v16 = vpop.xlane.xlu1 %615 }
 0x58a   :  { %v621_v17 = vadd.f32 %v620_v15, %v616_v16 }
 0x58c   :  { %623 = vst.msk [vmem:[%s991_s7] sm:$0x3] %vm622_vm5, %v621_v17 }
 0x58d   :  { %858 = dma.done.wait [#allocation4], 256  }
 0x58e   :  { %859 = vsyncadd [#allocation4], 4294967040 }
 0x58f   :  { %860 = dma.done.wait [#allocation10], 256  }
 0x590   :  { %861 = vsyncadd [#allocation10], 4294967040 }
 0x591   :  { %658 = vsyncpa [#allocation3], 1 }
 0x592   :  { %659 = vsyncpa [#allocation6], 1 }
 0x593   :  { %660 = vsyncpa [#allocation4], 1 }
 0x594   :  { %661 = vsyncpa [#allocation10], 1 }

</bundles_post_ra>
